<compile_context>
chip_gen: v5e
topology: v5e:2x2
jax: 0.10.0
libtpu: 0.0.40
codegen_flags: <defaults>
</compile_context>

<pallas_src>
import functools

import jax
import jax.numpy as jnp
from jax.experimental import pallas as pl
from jax.experimental.pallas import tpu as pltpu


def _round_up(n, m):
    return ((n + m - 1) // m) * m


def _cdiv(a, b):
    return (a + b - 1) // b


def _actor_kernel(x_ref, w1_ref, b1_ref, w2_ref, b2_ref, wh_ref, bh_ref, o_ref):
    # x is already bf16 (cast in the wrapper before DMA). MXU operands bf16,
    # accumulation f32; bias-add / ReLU stay in f32 on the VPU.
    h1 = jnp.dot(x_ref[...], w1_ref[...], preferred_element_type=jnp.float32)
    h1 = jnp.maximum(h1 + b1_ref[...], 0.0)
    h2 = jnp.dot(h1.astype(jnp.bfloat16), w2_ref[...],
                 preferred_element_type=jnp.float32)
    h2 = jnp.maximum(h2 + b2_ref[...], 0.0)
    # fused heads: one lane-dense matmul producing [mu | sigma | zero-pad]
    out = jnp.dot(h2.astype(jnp.bfloat16), wh_ref[...],
                  preferred_element_type=jnp.float32)
    o_ref[...] = (out + bh_ref[...]).astype(o_ref.dtype)


def prepare_actor_params(params):
    """One-time weight prep (run OUTSIDE the per-call hot path).

    Fuses the mu/sigma heads into a single lane-dense (128-wide, zero-padded)
    weight/bias block and casts all MXU weight operands to bf16.
    Returns (prepared_pytree, n_actions).
    """
    fc2_dims, n_actions = params["w_mu"].shape
    n_out = 2 * n_actions
    out_pad = _round_up(max(n_out, 128), 128)

    w_heads = jnp.zeros((fc2_dims, out_pad), jnp.float32)
    w_heads = w_heads.at[:, :n_actions].set(params["w_mu"])
    w_heads = w_heads.at[:, n_actions:n_out].set(params["w_sigma"])
    b_heads = jnp.zeros((1, out_pad), jnp.float32)
    b_heads = b_heads.at[:, :n_actions].set(params["b_mu"])
    b_heads = b_heads.at[:, n_actions:n_out].set(params["b_sigma"])

    prepped = {
        "w1": params["w1"].astype(jnp.bfloat16),
        "b1": params["b1"].astype(jnp.float32),
        "w2": params["w2"].astype(jnp.bfloat16),
        "b2": params["b2"].astype(jnp.float32),
        "w_heads": w_heads.astype(jnp.bfloat16),
        "b_heads": b_heads,
    }
    return prepped, n_actions


@functools.partial(jax.jit, static_argnames=("n_actions", "tb", "min_tiles"))
def actor_forward(observation, prepped, *, n_actions, tb=512, min_tiles=2):
    """ActorNetwork.forward -> (mu, sigma).

    observation: [B, input_dim]
    prepped:     pytree from prepare_actor_params (bf16 weights, fused heads)
    """
    # Cast to bf16 BEFORE padding/DMA: halves activation HBM->VMEM bytes and
    # removes the per-tile cast from the kernel.
    x = observation.astype(jnp.bfloat16)
    B, in_dim = x.shape
    fc1_dims = prepped["w1"].shape[1]
    fc2_dims = prepped["w2"].shape[1]
    out_pad = prepped["w_heads"].shape[1]
    n_out = 2 * n_actions

    # --- batch tiling ---------------------------------------------------
    # Pick the tile count first, then size each tile (multiple of 16 for the
    # bf16 sublane tile), so the padded remainder stays small instead of up
    # to a full tile. min_tiles=2 keeps both v7x TensorCores busy whenever
    # the batch is big enough to split.
    n_tiles = max(_cdiv(B, tb), 1)
    if min_tiles > 1 and _round_up(B, 16) >= 16 * min_tiles:
        n_tiles = max(n_tiles, min_tiles)
    tb_eff = _round_up(_cdiv(B, n_tiles), 16)
    B_pad = n_tiles * tb_eff
    if B_pad != B:
        x = jnp.pad(x, ((0, B_pad - B), (0, 0)))

    out = pl.pallas_call(
        _actor_kernel,
        out_shape=jax.ShapeDtypeStruct((B_pad, out_pad), jnp.float32),
        grid_spec=pltpu.PrefetchScalarGridSpec(
            num_scalar_prefetch=0,
            grid=(n_tiles,),
            in_specs=[
                # activations: tile over batch (bf16, lane dim = full in_dim)
                pl.BlockSpec((tb_eff, in_dim), lambda i: (i, 0)),
                # trunk weights / biases: full, grid-invariant blocks
                pl.BlockSpec((in_dim, fc1_dims), lambda i: (0, 0)),
                pl.BlockSpec((1, fc1_dims), lambda i: (0, 0)),
                pl.BlockSpec((fc1_dims, fc2_dims), lambda i: (0, 0)),
                pl.BlockSpec((1, fc2_dims), lambda i: (0, 0)),
                # fused, lane-padded head weights / biases
                pl.BlockSpec((fc2_dims, out_pad), lambda i: (0, 0)),
                pl.BlockSpec((1, out_pad), lambda i: (0, 0)),
            ],
            out_specs=pl.BlockSpec((tb_eff, out_pad), lambda i: (i, 0)),
        ),
        compiler_params=pltpu.CompilerParams(
            dimension_semantics=("parallel",),
        ),
    )(x, prepped["w1"], prepped["b1"], prepped["w2"], prepped["b2"],
      prepped["w_heads"], prepped["b_heads"])

    # One contiguous slice of the useful lanes, then split the small result.
    heads = out[:B, :n_out]
    mu = heads[:, :n_actions]
    sigma = heads[:, n_actions:]
    return mu, sigma


def init_actor_params(key, input_dim, fc1_dims, fc2_dims, n_actions):
    """Synthetic params matching torch nn.Linear default init:
    U(-1/sqrt(fan_in), 1/sqrt(fan_in)). Weights stored [in, out]."""
    ks = jax.random.split(key, 8)

    def lin(kw, kb, fan_in, fan_out):
        bound = 1.0 / (fan_in ** 0.5)
        w = jax.random.uniform(kw, (fan_in, fan_out), jnp.float32, -bound, bound)
        b = jax.random.uniform(kb, (1, fan_out), jnp.float32, -bound, bound)
        return w, b

    w1, b1 = lin(ks[0], ks[1], input_dim, fc1_dims)
    w2, b2 = lin(ks[2], ks[3], fc1_dims, fc2_dims)
    w_mu, b_mu = lin(ks[4], ks[5], fc2_dims, n_actions)
    w_sigma, b_sigma = lin(ks[6], ks[7], fc2_dims, n_actions)
    return {"w1": w1, "b1": b1, "w2": w2, "b2": b2,
            "w_mu": w_mu, "b_mu": b_mu, "w_sigma": w_sigma, "b_sigma": b_sigma}


def _ref_forward(x, p):
    """Pure-JAX reference with the same bf16-operand / f32-accumulate math."""
    bf = jnp.bfloat16
    xb = x.astype(bf)
    h1 = jnp.maximum(jnp.dot(xb, p["w1"].astype(bf),
                             preferred_element_type=jnp.float32) + p["b1"], 0.0)
    h2 = jnp.maximum(jnp.dot(h1.astype(bf), p["w2"].astype(bf),
                             preferred_element_type=jnp.float32) + p["b2"], 0.0)
    mu = jnp.dot(h2.astype(bf), p["w_mu"].astype(bf),
                 preferred_element_type=jnp.float32) + p["b_mu"]
    sg = jnp.dot(h2.astype(bf), p["w_sigma"].astype(bf),
                 preferred_element_type=jnp.float32) + p["b_sigma"]
    return mu, sg


if __name__ == "__main__":
    # Small shapes consistent with ActorNetwork(lr, input_dims=(32,), 64, 64, 12).
    input_dim, fc1_dims, fc2_dims, n_actions = 32, 64, 64, 12

    key = jax.random.PRNGKey(0)
    k_obs1, k_obs2, k_params = jax.random.split(key, 3)
    params = init_actor_params(k_params, input_dim, fc1_dims, fc2_dims, n_actions)

    # One-time weight preparation (out of the per-call hot path).
    prepped, na = prepare_actor_params(params)
    prepped = jax.block_until_ready(prepped)

    ok = True
    # batch=10: NOT a multiple of 16 -> exercises the padding path (grid=(1,)).
    # batch=48: exercises the multi-tile path (grid=(2,), both TCs on v7x).
    for batch, k_obs in ((10, k_obs1), (48, k_obs2)):
        obs = jax.random.normal(k_obs, (batch, input_dim), dtype=jnp.float32)
        mu, sigma = actor_forward(obs, prepped, n_actions=na)
        mu, sigma = jax.block_until_ready((mu, sigma))

        mu_ref, sigma_ref = _ref_forward(obs, params)
        assert mu.shape == (batch, n_actions) and sigma.shape == (batch, n_actions)
        ok &= bool(jnp.allclose(mu, mu_ref, atol=2e-2, rtol=2e-2))
        ok &= bool(jnp.allclose(sigma, sigma_ref, atol=2e-2, rtol=2e-2))

    assert ok, "mu/sigma mismatch vs reference"

    # TODO(synk): torch-side .to(device) conversion and the Adam optimizer are
    # host/training machinery, not part of the forward pass, and are omitted.
    print("KERNEL_OK")
</pallas_src>

<mosaic_0001>
module attributes {stable_mosaic.version = 11 : i64} {
  func.func @_actor_kernel(%arg0: i32, %arg1: memref<16x32xbf16, #tpu.memory_space<vmem>>, %arg2: memref<32x64xbf16, #tpu.memory_space<vmem>>, %arg3: memref<1x64xf32, #tpu.memory_space<vmem>>, %arg4: memref<64x64xbf16, #tpu.memory_space<vmem>>, %arg5: memref<1x64xf32, #tpu.memory_space<vmem>>, %arg6: memref<64x128xbf16, #tpu.memory_space<vmem>>, %arg7: memref<1x128xf32, #tpu.memory_space<vmem>>, %arg8: memref<16x128xf32, #tpu.memory_space<vmem>>) attributes {dimension_semantics = [#tpu.dimension_semantics<parallel>], iteration_bounds = array<i64: 1>, scalar_prefetch = 0 : i64, scratch_operands = 0 : i64, tpu.core_type = #tpu.core_type<tc>, window_params = [{transform_indices = @transform_0, window_bounds = array<i64: 16, 32>}, {pipeline_mode = #tpu.pipeline_mode<synchronous>, transform_indices = @transform_1, window_bounds = array<i64: 32, 64>}, {pipeline_mode = #tpu.pipeline_mode<synchronous>, transform_indices = @transform_2, window_bounds = array<i64: 1, 64>}, {pipeline_mode = #tpu.pipeline_mode<synchronous>, transform_indices = @transform_3, window_bounds = array<i64: 64, 64>}, {pipeline_mode = #tpu.pipeline_mode<synchronous>, transform_indices = @transform_4, window_bounds = array<i64: 1, 64>}, {pipeline_mode = #tpu.pipeline_mode<synchronous>, transform_indices = @transform_5, window_bounds = array<i64: 64, 128>}, {pipeline_mode = #tpu.pipeline_mode<synchronous>, transform_indices = @transform_6, window_bounds = array<i64: 1, 128>}, {transform_indices = @transform_7, window_bounds = array<i64: 16, 128>}]} {
    %c0 = arith.constant 0 : index
    %c0_0 = arith.constant 0 : index
    %0 = vector.load %arg1[%c0, %c0_0] : memref<16x32xbf16, #tpu.memory_space<vmem>>, vector<16x32xbf16>
    %c0_1 = arith.constant 0 : index
    %c0_2 = arith.constant 0 : index
    %1 = vector.load %arg2[%c0_1, %c0_2] : memref<32x64xbf16, #tpu.memory_space<vmem>>, vector<32x64xbf16>
    %cst = arith.constant dense<0.000000e+00> : vector<16x64xf32>
    %2 = tpu.matmul %0, %1, %cst {dimension_numbers = #tpu.dot_dimension_numbers<[1], [0], [0], [1], [0, 0, 1, 1], [], []>} : vector<16x32xbf16>, vector<32x64xbf16>, vector<16x64xf32> -> vector<16x64xf32>
    %c0_3 = arith.constant 0 : index
    %c0_4 = arith.constant 0 : index
    %3 = vector.load %arg3[%c0_3, %c0_4] : memref<1x64xf32, #tpu.memory_space<vmem>>, vector<1x64xf32>
    %4 = vector.broadcast %3 : vector<1x64xf32> to vector<16x64xf32>
    %5 = arith.addf %2, %4 : vector<16x64xf32>
    %cst_5 = arith.constant 0.000000e+00 : f32
    %6 = vector.broadcast %cst_5 : f32 to vector<16x64xf32>
    %7 = arith.maximumf %5, %6 : vector<16x64xf32>
    %8 = arith.truncf %7 : vector<16x64xf32> to vector<16x64xbf16>
    %c0_6 = arith.constant 0 : index
    %c0_7 = arith.constant 0 : index
    %9 = vector.load %arg4[%c0_6, %c0_7] : memref<64x64xbf16, #tpu.memory_space<vmem>>, vector<64x64xbf16>
    %cst_8 = arith.constant dense<0.000000e+00> : vector<16x64xf32>
    %10 = tpu.matmul %8, %9, %cst_8 {dimension_numbers = #tpu.dot_dimension_numbers<[1], [0], [0], [1], [0, 0, 1, 1], [], []>} : vector<16x64xbf16>, vector<64x64xbf16>, vector<16x64xf32> -> vector<16x64xf32>
    %c0_9 = arith.constant 0 : index
    %c0_10 = arith.constant 0 : index
    %11 = vector.load %arg5[%c0_9, %c0_10] : memref<1x64xf32, #tpu.memory_space<vmem>>, vector<1x64xf32>
    %12 = vector.broadcast %11 : vector<1x64xf32> to vector<16x64xf32>
    %13 = arith.addf %10, %12 : vector<16x64xf32>
    %cst_11 = arith.constant 0.000000e+00 : f32
    %14 = vector.broadcast %cst_11 : f32 to vector<16x64xf32>
    %15 = arith.maximumf %13, %14 : vector<16x64xf32>
    %16 = arith.truncf %15 : vector<16x64xf32> to vector<16x64xbf16>
    %c0_12 = arith.constant 0 : index
    %c0_13 = arith.constant 0 : index
    %17 = vector.load %arg6[%c0_12, %c0_13] : memref<64x128xbf16, #tpu.memory_space<vmem>>, vector<64x128xbf16>
    %cst_14 = arith.constant dense<0.000000e+00> : vector<16x128xf32>
    %18 = tpu.matmul %16, %17, %cst_14 {dimension_numbers = #tpu.dot_dimension_numbers<[1], [0], [0], [1], [0, 0, 1, 1], [], []>} : vector<16x64xbf16>, vector<64x128xbf16>, vector<16x128xf32> -> vector<16x128xf32>
    %c0_15 = arith.constant 0 : index
    %c0_16 = arith.constant 0 : index
    %19 = vector.load %arg7[%c0_15, %c0_16] : memref<1x128xf32, #tpu.memory_space<vmem>>, vector<1x128xf32>
    %20 = vector.broadcast %19 : vector<1x128xf32> to vector<16x128xf32>
    %21 = arith.addf %18, %20 : vector<16x128xf32>
    %c0_17 = arith.constant 0 : index
    %c0_18 = arith.constant 0 : index
    %22 = vector.load %arg8[%c0_17, %c0_18] : memref<16x128xf32, #tpu.memory_space<vmem>>, vector<16x128xf32>
    tpu.vector_store %arg8[%c0_17, %c0_18], %21 {strides = array<i32>} : memref<16x128xf32, #tpu.memory_space<vmem>>, vector<16x128xf32>,
    return
  }
  func.func @transform_0(%arg0: i32) -> (i32, i32) {
    %c0_i32 = arith.constant 0 : i32
    %c0_i32_0 = arith.constant 0 : i32
    return %arg0, %c0_i32 : i32, i32
  }
  func.func @transform_1(%arg0: i32) -> (i32, i32) {
    %c0_i32 = arith.constant 0 : i32
    %c0_i32_0 = arith.constant 0 : i32
    %c0_i32_1 = arith.constant 0 : i32
    return %c0_i32, %c0_i32_0 : i32, i32
  }
  func.func @transform_2(%arg0: i32) -> (i32, i32) {
    %c0_i32 = arith.constant 0 : i32
    %c0_i32_0 = arith.constant 0 : i32
    %c0_i32_1 = arith.constant 0 : i32
    return %c0_i32, %c0_i32_0 : i32, i32
  }
  func.func @transform_3(%arg0: i32) -> (i32, i32) {
    %c0_i32 = arith.constant 0 : i32
    %c0_i32_0 = arith.constant 0 : i32
    %c0_i32_1 = arith.constant 0 : i32
    return %c0_i32, %c0_i32_0 : i32, i32
  }
  func.func @transform_4(%arg0: i32) -> (i32, i32) {
    %c0_i32 = arith.constant 0 : i32
    %c0_i32_0 = arith.constant 0 : i32
    %c0_i32_1 = arith.constant 0 : i32
    return %c0_i32, %c0_i32_0 : i32, i32
  }
  func.func @transform_5(%arg0: i32) -> (i32, i32) {
    %c0_i32 = arith.constant 0 : i32
    %c0_i32_0 = arith.constant 0 : i32
    %c0_i32_1 = arith.constant 0 : i32
    return %c0_i32, %c0_i32_0 : i32, i32
  }
  func.func @transform_6(%arg0: i32) -> (i32, i32) {
    %c0_i32 = arith.constant 0 : i32
    %c0_i32_0 = arith.constant 0 : i32
    %c0_i32_1 = arith.constant 0 : i32
    return %c0_i32, %c0_i32_0 : i32, i32
  }
  func.func @transform_7(%arg0: i32) -> (i32, i32) {
    %c0_i32 = arith.constant 0 : i32
    %c0_i32_0 = arith.constant 0 : i32
    return %arg0, %c0_i32 : i32, i32
  }
}

</mosaic_0001>

<bundles_post_ra>
// kernel: actor_forward.1
= control target key start
LH: loop header
LB: loop body
LE: loop exit
PB: predicated region body
PF: predicated region fallthrough
CT: control target
= control target key end

     0   :  { %12 = vsyncpa [#allocation3], 0  ;;  %s424_s0 = inlined_call_operand.vmem [shape: bf16[16,32], index: 0, kind: input, shape index: {}]   ;;  %s425_s1 = inlined_call_operand.hbm [shape: bf16[32,64], index: 1, kind: input, shape index: {}]   ;;  %s426_s2 = inlined_call_operand.vmem [shape: f32[1,64], index: 2, kind: input, shape index: {}]   ;;  %s427_s3 = inlined_call_operand.vmem [shape: bf16[64,64], index: 3, kind: input, shape index: {}]   ;;  %s428_s4 = inlined_call_operand.vmem [shape: f32[1,64], index: 4, kind: input, shape index: {}]   ;;  %s429_s5 = inlined_call_operand.hbm [shape: bf16[64,128], index: 5, kind: input, shape index: {}]   ;;  %s430_s6 = inlined_call_operand.vmem [shape: f32[1,128], index: 6, kind: input, shape index: {}]   ;;  %s431_s7 = inlined_call_operand.vmem [shape: f32[16,128], index: 7, kind: output, shape index: {}]  }
   0x1   :  { %s20_s26 = sshll.u32 %s425_s1, 4  ;;  %s21_s26 = int_to_ptr.hbm [resolvable:$true] %s20_s26 }
   0x2   :  { %13 = vsyncpa [#allocation5], 0  ;;  %s342_s27 = smov [#allocation2]   ;;  %s39_s8 = sshll.u32 %s429_s5, 4  ;;  %s40_s8 = int_to_ptr.hbm [resolvable:$true] %s39_s8 }
   0x3   :  { %s22_s28 = sshll.u32 %s342_s27, 4  ;;  %s343_s9 = smov 64   ;;  %s23_s28 = int_to_ptr.vmem [resolvable:$true] %s22_s28 }
   0x4   :  { %s344_s10 = smov 4   ;;  %s345_s11 = smov [#allocation4]  }
   0x5   :  { %28 = dma.hbm_to_vmem [thread:$0]  %s21_s26, 256, %s23_s28, [#allocation3], %s343_s9, %s343_s9, %s344_s10  }
   0x6   :  { %s41_s12 = sshll.u32 %s345_s11, 4  ;;  %s42_s12 = int_to_ptr.vmem [resolvable:$true] %s41_s12 }
   0x7   :  { %47 = dma.hbm_to_vmem [thread:$0]  %s40_s8, 512, %s42_s12, [#allocation5], %s343_s9, %s343_s9, %s344_s10  }
   0x8   :  { %338 = dma.done.wait [#allocation3], 256  }
   0x9   :  { %339 = vsyncadd [#allocation3], 4294967040 }
   0xa   :  { %340 = dma.done.wait [#allocation5], 512  }
   0xb   :  { %341 = vsyncadd [#allocation5], 4294966784  ;;  %v274_v0 = vld [vmem:[#allocation2 + $0x8] sm:$0xff]  ;;  %v273_v1 = vld [vmem:[#allocation2] sm:$0xff]  ;;  %vm86_vm0 = vcmask 261120   ;;  %vm143_vm1 = vcmask 523264  }
   0xc   :  { %96 = vmatpush.bf16.msra.mxu0 %v274_v0  ;;  %v272_v2 = vld [vmem:[%s424_s0] sm:$0xff]  ;;  %v278_v3 = vld [vmem:[%s427_s3 + $0x18] sm:$0xff]  ;;  %v277_v4 = vld [vmem:[%s427_s3 + $0x10] sm:$0xff] }
   0xd   :  { %151 = vmatpush.bf16.msra.mxu1 %v278_v3  ;;  %v276_v5 = vld [vmem:[%s427_s3 + $0x8] sm:$0xff]  ;;  %v275_v6 = vld [vmem:[%s427_s3] sm:$0xff]  ;;  %v280_v17 = vld [vmem:[#allocation4 + $0x8] sm:$0xff] }
   0xe   :  { %v287_v8 = vld [vmem:[%s426_s2] ss:$0 sm:$0xff]  ;;  %v282_v15 = vld [vmem:[#allocation4 + $0x18] sm:$0xff]  ;;  %v279_v18 = vld [vmem:[#allocation4] sm:$0xff] }
   0xf   :  { %207 = vmatpush.bf16.msra.mxu2 %v282_v15  ;;  %v281_v16 = vld [vmem:[#allocation4 + $0x10] sm:$0xff] }
  0x10   :  { %97 = vmatpush.bf16.msra.mxu0 %v273_v1  ;;  %v288_v20 = vld [vmem:[%s428_s4] ss:$0 sm:$0xff] }
  0x11   :  { %152 = vmatpush.bf16.msra.mxu1 %v277_v4  ;;  %v289_v27 = vld [vmem:[%s430_s6] ss:$0 sm:$0xff] }
  0x13   :  { %237 = vmatmul.msk.bf16.vlgmr.msra.gmra.mxu0 %vm86_vm0, %v272_v2  ;;  %208 = vmatpush.bf16.msra.mxu2 %v281_v16 }
  0x15   :  { %153 = vmatpush.bf16.msra.mxu1 %v276_v5 }
  0x17   :  { %209 = vmatpush.bf16.msra.mxu2 %v280_v17 }
  0x19   :  { %154 = vmatpush.bf16.msra.mxu1 %v275_v6 }
  0x1b   :  { %210 = vmatpush.bf16.msra.mxu2 %v279_v18 }
  0x90   :  { %v99_v7 = vpop.f32.mrf.mxu0 }
  0x91   :  { %v100_v9 = vadd.f32 %v287_v8, %v99_v7 }
  0x93   :  { %v104_v12 = vmax.f32 %v100_v9, 0.0 }
  0x98   :  { %v101_v10 = vpop.f32.mrf.mxu0 }
  0x99   :  { %v102_v11 = vadd.f32 %v287_v8, %v101_v10 }
  0x9b   :  { %v105_v13 = vmax.f32 %v102_v11, 0.0 }
  0x9d   :  { %v106_v14 = vpack.c.bf16 %v105_v13, %v104_v12 }
  0x9f   :  { %254 = vmatmul.msk.bf16.vlgmr.msra.gmra.mxu1 %vm143_vm1, %v106_v14 }
 0x11c   :  { %v156_v19 = vpop.f32.mrf.mxu1 }
 0x11d   :  { %v157_v21 = vadd.f32 %v288_v20, %v156_v19 }
 0x11f   :  { %v161_v24 = vmax.f32 %v157_v21, 0.0 }
 0x124   :  { %v158_v22 = vpop.f32.mrf.mxu1 }
 0x125   :  { %v159_v23 = vadd.f32 %v288_v20, %v158_v22 }
 0x127   :  { %v162_v25 = vmax.f32 %v159_v23, 0.0 }
 0x129   :  { %v163_v26 = vpack.c.bf16 %v162_v25, %v161_v24 }
 0x12b   :  { %271 = vmatmul.msk.bf16.vlgmr.msra.gmra.mxu2 %vm143_vm1, %v163_v26 }
 0x1ae   :  { %v212_v28 = vpop.f32.mrf.mxu2 }
 0x1af   :  { %v213_v29 = vadd.f32 %v289_v27, %v212_v28 }
 0x1b1   :  { %217 = vst [vmem:[%s431_s7] sm:$0xff] %v213_v29 }
 0x1b6   :  { %v214_v30 = vpop.f32.mrf.mxu2 }
 0x1b7   :  { %v215_v31 = vadd.f32 %v289_v27, %v214_v30 }
 0x1b9   :  { %218 = vst [vmem:[%s431_s7 + $0x8] sm:$0xff] %v215_v31 }
 0x1ba   :  { %223 = vsyncpa [#allocation3], 1 }
 0x1bb   :  { %224 = vsyncpa [#allocation5], 1 }

</bundles_post_ra>
